<compile_context>
chip_gen: v7x
topology: tpu7x:2x2x1
jax: 0.10.0
libtpu: 0.0.40
codegen_flags: <defaults>
</compile_context>

<pallas_src>
import functools

import jax
import jax.numpy as jnp
from jax.experimental import pallas as pl
from jax.experimental.pallas import tpu as pltpu


# ---------------------------------------------------------------------------
# Fused kernel.  grid = (B, T // tq).  Per step: one batch element, one query
# tile.  Weights are VMEM-resident (constant block index).
# ---------------------------------------------------------------------------
def _mha_kernel(xq_ref, xkv_ref, wqkv_ref, wp_ref, bias_ref, o_ref, *,
                num_heads, head_size):
    C = num_heads * head_size
    dt = xq_ref.dtype                       # matmul / MXU dtype (f32 or bf16)

    xq = xq_ref[0]                          # (tq, C) query rows of this tile
    xkv = xkv_ref[0]                        # (T,  C) full sequence for K/V
    tq = xq.shape[0]
    T = xkv.shape[0]

    # One wide Q projection for this tile (scale C**-0.5 pre-folded into W_q)
    # and one wide K/V projection for all heads: full-depth (K=C) MXU matmuls.
    q_all = jnp.dot(xq, wqkv_ref[:, 0:C],
                    preferred_element_type=jnp.float32).astype(dt)      # (tq, C)
    kv_all = jnp.dot(xkv, wqkv_ref[:, C:3 * C],
                     preferred_element_type=jnp.float32).astype(dt)     # (T, 2C)
    k_all = kv_all[:, 0:C]
    v_all = kv_all[:, C:2 * C]

    # Causal mask: built once per tile, shared by every head.
    row0 = pl.program_id(1) * tq
    row = row0 + jax.lax.broadcasted_iota(jnp.int32, (tq, T), 0)
    col = jax.lax.broadcasted_iota(jnp.int32, (tq, T), 1)
    causal = col <= row

    # Static unroll over heads (num_heads is small and known at trace time).
    head_outs = []
    for h in range(num_heads):
        lo = h * head_size
        q = q_all[:, lo:lo + head_size]                       # (tq, hs)
        k = k_all[:, lo:lo + head_size]                       # (T,  hs)
        v = v_all[:, lo:lo + head_size]                       # (T,  hs)

        # Scores: contract last dims (no explicit transpose / XLU pass).
        s = jax.lax.dot_general(q, k, (((1,), (1,)), ((), ())),
                                preferred_element_type=jnp.float32)  # (tq, T)
        s = jnp.where(causal, s, -jnp.inf)

        # Softmax in f32 (every row contains its diagonal -> finite max).
        s = s - jnp.max(s, axis=-1, keepdims=True)
        p = jnp.exp(s)
        p = p * pl.reciprocal(jnp.sum(p, axis=-1, keepdims=True), approx=True)

        head_outs.append(jnp.dot(p.astype(dt), v,
                                 preferred_element_type=jnp.float32))  # (tq, hs)

    # Concat all heads, then ONE full-depth output projection + bias.
    concat = jnp.concatenate(head_outs, axis=-1).astype(dt)             # (tq, C)
    out = jnp.dot(concat, wp_ref[...], preferred_element_type=jnp.float32)
    o_ref[0] = (out + bias_ref[...]).astype(o_ref.dtype)
    # TODO(synk): dropout omitted (identity in eval / deterministic forward).


# ---------------------------------------------------------------------------
# One-time parameter packing (call at parameter-load time, NOT per forward).
# ---------------------------------------------------------------------------
def pack_mha_params(wq, wk, wv, w_proj, b_proj, dtype=jnp.float32):
    """
    wq/wk/wv: (H, C, hs) laid out so q = x @ wq[h]   (nn.Linear weight^T)
    w_proj:   (C, C)  PyTorch nn.Linear layout (out_features, in_features)
    b_proj:   (C,)
    Returns (w_qkv (C,3C), w_proj_t (C,C), bias (1,C) f32).
    """
    H, C, hs = wq.shape
    scale = float(C) ** -0.5
    # Fold the attention scale into W_q — zero runtime cost, exact.
    q_cols = jnp.transpose(wq * scale, (1, 0, 2)).reshape(C, H * hs)
    k_cols = jnp.transpose(wk, (1, 0, 2)).reshape(C, H * hs)
    v_cols = jnp.transpose(wv, (1, 0, 2)).reshape(C, H * hs)
    w_qkv = jnp.concatenate([q_cols, k_cols, v_cols], axis=-1)       # (C, 3C)
    w_proj_t = jnp.transpose(w_proj, (1, 0))                          # (C, C)
    bias2d = b_proj.reshape(1, C).astype(jnp.float32)
    return w_qkv.astype(dtype), w_proj_t.astype(dtype), bias2d


def multihead_attention(x, packed_params, *, n_heads, q_block_size=None):
    """x: (B, T, C). packed_params from pack_mha_params. Returns (B, T, C) f32."""
    w_qkv, w_proj_t, bias2d = packed_params
    B, T, C = x.shape
    hs = C // n_heads
    tq = q_block_size if q_block_size is not None else min(T, 256)
    assert T % tq == 0, "q_block_size must divide T"

    x = x.astype(w_qkv.dtype)   # bf16 path: activations match weight dtype

    kernel = functools.partial(_mha_kernel, num_heads=n_heads, head_size=hs)

    # Rough per-step VMEM estimate (resident weights + double-buffered x/out
    # blocks + transient qkv / scores / concat); raise scoped limit only if
    # the default would be too small.
    isz = w_qkv.dtype.itemsize
    est = ((3 * C * C + C * C + C) * isz                 # resident weights
           + 2 * (tq * C + T * C) * isz                  # x blocks, dbl-buffered
           + 2 * tq * C * 4                              # out block, dbl-buffered
           + (T * 3 * C + tq * T + 2 * tq * C) * 4)      # transients (f32)
    cp_kwargs = dict(dimension_semantics=("parallel", "parallel"))
    if est > (28 << 20):
        # TODO(synk): cap nearer ~48-56 MiB when targeting v7x (64 MiB physical).
        cp_kwargs["vmem_limit_bytes"] = int(min(2 * est, 100 << 20))

    return pl.pallas_call(
        kernel,
        out_shape=jax.ShapeDtypeStruct((B, T, C), jnp.float32),
        grid=(B, T // tq),
        in_specs=[
            pl.BlockSpec((1, tq, C), lambda b, qi: (b, qi, 0)),   # x (query tile)
            pl.BlockSpec((1, T, C), lambda b, qi: (b, 0, 0)),     # x (full, for K/V)
            pl.BlockSpec((C, 3 * C), lambda b, qi: (0, 0)),       # packed QKV weights (resident)
            pl.BlockSpec((C, C), lambda b, qi: (0, 0)),           # proj weight^T (resident)
            pl.BlockSpec((1, C), lambda b, qi: (0, 0)),           # proj bias (resident)
        ],
        out_specs=pl.BlockSpec((1, tq, C), lambda b, qi: (b, qi, 0)),
        compiler_params=pltpu.CompilerParams(**cp_kwargs),
    )(x, x, w_qkv, w_proj_t, bias2d)


# ---------------------------------------------------------------------------
# Pure-JAX reference (mirrors the PyTorch module exactly).
# ---------------------------------------------------------------------------
def _reference(x, wq, wk, wv, w_proj, b_proj):
    B, T, C = x.shape
    H = wq.shape[0]
    scale = C ** -0.5
    mask = jnp.tril(jnp.ones((T, T)))
    outs = []
    for h in range(H):
        q = x @ wq[h]
        k = x @ wk[h]
        v = x @ wv[h]
        wei = (q @ jnp.swapaxes(k, -2, -1)) * scale
        wei = jnp.where(mask == 0, -jnp.inf, wei)
        wei = jax.nn.softmax(wei, axis=-1)
        outs.append(wei @ v)
    cat = jnp.concatenate(outs, axis=-1)
    return cat @ w_proj.T + b_proj


if __name__ == "__main__":
    # Small shapes consistent with the module.
    B, T = 2, 8
    n_embd, n_heads = 32, 4
    head_size = n_embd // n_heads

    key = jax.random.PRNGKey(0)
    kx, kq, kk, kv, kp, kb, kx2 = jax.random.split(key, 7)

    x = jax.random.normal(kx, (B, T, n_embd), dtype=jnp.float32)
    wq = 0.05 * jax.random.normal(kq, (n_heads, n_embd, head_size), dtype=jnp.float32)
    wk = 0.05 * jax.random.normal(kk, (n_heads, n_embd, head_size), dtype=jnp.float32)
    wv = 0.05 * jax.random.normal(kv, (n_heads, n_embd, head_size), dtype=jnp.float32)
    w_proj = 0.05 * jax.random.normal(kp, (n_embd, n_embd), dtype=jnp.float32)
    b_proj = 0.05 * jax.random.normal(kb, (n_embd,), dtype=jnp.float32)

    # --- f32 check (single query tile) -------------------------------------
    packed_f32 = pack_mha_params(wq, wk, wv, w_proj, b_proj, dtype=jnp.float32)
    y = jax.block_until_ready(multihead_attention(x, packed_f32, n_heads=n_heads))
    y_ref = _reference(x, wq, wk, wv, w_proj, b_proj)
    assert y.shape == (B, T, n_embd)
    assert jnp.allclose(y, y_ref, atol=2e-3, rtol=2e-3), "f32 mismatch vs reference"

    # --- f32 check with multiple query tiles (exercises the q-tile axis) ---
    T2 = 16
    x2 = jax.random.normal(kx2, (B, T2, n_embd), dtype=jnp.float32)
    y2 = jax.block_until_ready(
        multihead_attention(x2, packed_f32, n_heads=n_heads, q_block_size=8))
    y2_ref = _reference(x2, wq, wk, wv, w_proj, b_proj)
    assert jnp.allclose(y2, y2_ref, atol=2e-3, rtol=2e-3), "tiled mismatch vs reference"

    # --- bf16 MXU path (f32 accumulation + f32 softmax), loose tolerance ---
    packed_bf16 = pack_mha_params(wq, wk, wv, w_proj, b_proj, dtype=jnp.bfloat16)
    y_bf16 = jax.block_until_ready(multihead_attention(x, packed_bf16, n_heads=n_heads))
    assert jnp.allclose(y_bf16, y_ref, atol=3e-2, rtol=3e-2), "bf16 mismatch vs reference"

    print("KERNEL_OK")
</pallas_src>

<mosaic_0001>
module attributes {stable_mosaic.version = 11 : i64} {
  func.func @_mha_kernel(%arg0: i32, %arg1: i32, %arg2: memref<1x8x32xf32, #tpu.memory_space<vmem>>, %arg3: memref<1x8x32xf32, #tpu.memory_space<vmem>>, %arg4: memref<32x96xf32, #tpu.memory_space<vmem>>, %arg5: memref<32x32xf32, #tpu.memory_space<vmem>>, %arg6: memref<1x32xf32, #tpu.memory_space<vmem>>, %arg7: memref<1x8x32xf32, #tpu.memory_space<vmem>>) attributes {dimension_semantics = [#tpu.dimension_semantics<parallel>, #tpu.dimension_semantics<parallel>], iteration_bounds = array<i64: 2, 1>, scalar_prefetch = 0 : i64, scratch_operands = 0 : i64, tpu.core_type = #tpu.core_type<tc>, window_params = [{transform_indices = @transform_0, window_bounds = array<i64: 1, 8, 32>}, {transform_indices = @transform_1, window_bounds = array<i64: 1, 8, 32>}, {pipeline_mode = #tpu.pipeline_mode<synchronous>, transform_indices = @transform_2, window_bounds = array<i64: 32, 96>}, {pipeline_mode = #tpu.pipeline_mode<synchronous>, transform_indices = @transform_3, window_bounds = array<i64: 32, 32>}, {pipeline_mode = #tpu.pipeline_mode<synchronous>, transform_indices = @transform_4, window_bounds = array<i64: 1, 32>}, {transform_indices = @transform_5, window_bounds = array<i64: 1, 8, 32>}]} {
    %c0 = arith.constant 0 : index
    %c0_0 = arith.constant 0 : index
    %c0_1 = arith.constant 0 : index
    %0 = vector.load %arg2[%c0, %c0_0, %c0_1] : memref<1x8x32xf32, #tpu.memory_space<vmem>>, vector<1x8x32xf32>
    %1 = vector.shape_cast %0 : vector<1x8x32xf32> to vector<8x32xf32>
    %c0_2 = arith.constant 0 : index
    %c0_3 = arith.constant 0 : index
    %c0_4 = arith.constant 0 : index
    %2 = vector.load %arg3[%c0_2, %c0_3, %c0_4] : memref<1x8x32xf32, #tpu.memory_space<vmem>>, vector<1x8x32xf32>
    %3 = vector.shape_cast %2 : vector<1x8x32xf32> to vector<8x32xf32>
    %c0_5 = arith.constant 0 : index
    %c0_6 = arith.constant 0 : index
    %4 = vector.load %arg4[%c0_5, %c0_6] : memref<32x96xf32, #tpu.memory_space<vmem>>, vector<32x32xf32>
    %cst = arith.constant dense<0.000000e+00> : vector<8x32xf32>
    %5 = tpu.matmul %1, %4, %cst {dimension_numbers = #tpu.dot_dimension_numbers<[1], [0], [0], [1], [0, 0, 1, 1], [], []>} : vector<8x32xf32>, vector<32x32xf32>, vector<8x32xf32> -> vector<8x32xf32>
    %c0_7 = arith.constant 0 : index
    %c32 = arith.constant 32 : index
    %6 = vector.load %arg4[%c0_7, %c32] : memref<32x96xf32, #tpu.memory_space<vmem>>, vector<32x64xf32>
    %cst_8 = arith.constant dense<0.000000e+00> : vector<8x64xf32>
    %7 = tpu.matmul %3, %6, %cst_8 {dimension_numbers = #tpu.dot_dimension_numbers<[1], [0], [0], [1], [0, 0, 1, 1], [], []>} : vector<8x32xf32>, vector<32x64xf32>, vector<8x64xf32> -> vector<8x64xf32>
    %8 = vector.extract_strided_slice %7 {offsets = [0, 0], sizes = [8, 32], strides = [1, 1]} : vector<8x64xf32> to vector<8x32xf32>
    %9 = vector.extract_strided_slice %7 {offsets = [0, 32], sizes = [8, 32], strides = [1, 1]} : vector<8x64xf32> to vector<8x32xf32>
    %c8_i32 = arith.constant 8 : i32
    %10 = arith.muli %arg1, %c8_i32 : i32
    %11 = tpu.iota {dimensions = array<i32: 0>} : vector<8x8xi32>
    %12 = vector.broadcast %10 : i32 to vector<8x8xi32>
    %13 = arith.addi %12, %11 : vector<8x8xi32>
    %14 = tpu.iota {dimensions = array<i32: 1>} : vector<8x8xi32>
    %15 = arith.cmpi sle, %14, %13 : vector<8x8xi32>
    %16 = vector.extract_strided_slice %5 {offsets = [0, 0], sizes = [8, 8], strides = [1, 1]} : vector<8x32xf32> to vector<8x8xf32>
    %17 = vector.extract_strided_slice %8 {offsets = [0, 0], sizes = [8, 8], strides = [1, 1]} : vector<8x32xf32> to vector<8x8xf32>
    %18 = vector.extract_strided_slice %9 {offsets = [0, 0], sizes = [8, 8], strides = [1, 1]} : vector<8x32xf32> to vector<8x8xf32>
    %cst_9 = arith.constant dense<0.000000e+00> : vector<8x8xf32>
    %19 = tpu.matmul %16, %17, %cst_9 {dimension_numbers = #tpu.dot_dimension_numbers<[1], [1], [0], [0], [0, 0, 1, 0], [], []>} : vector<8x8xf32>, vector<8x8xf32>, vector<8x8xf32> -> vector<8x8xf32>
    %cst_10 = arith.constant 0xFF800000 : f32
    %20 = vector.broadcast %cst_10 : f32 to vector<8x8xf32>
    %21 = arith.select %15, %19, %20 : vector<8x8xi1>, vector<8x8xf32>
    %cst_11 = arith.constant dense<0xFF800000> : vector<8xf32>
    %22 = vector.multi_reduction <maximumf>, %21, %cst_11 [1] : vector<8x8xf32> to vector<8xf32>
    %23 = vector.shape_cast %22 : vector<8xf32> to vector<8x1xf32>
    %24 = vector.broadcast %23 : vector<8x1xf32> to vector<8x8xf32>
    %25 = arith.subf %21, %24 : vector<8x8xf32>
    %26 = math.exp %25 : vector<8x8xf32>
    %cst_12 = arith.constant dense<0.000000e+00> : vector<8xf32>
    %27 = vector.multi_reduction <add>, %26, %cst_12 [1] : vector<8x8xf32> to vector<8xf32>
    %28 = vector.shape_cast %27 : vector<8xf32> to vector<8x1xf32>
    %29 = tpu.reciprocal %28 {approx = true} : vector<8x1xf32> -> vector<8x1xf32>
    %30 = vector.broadcast %29 : vector<8x1xf32> to vector<8x8xf32>
    %31 = arith.mulf %26, %30 : vector<8x8xf32>
    %cst_13 = arith.constant dense<0.000000e+00> : vector<8x8xf32>
    %32 = tpu.matmul %31, %18, %cst_13 {dimension_numbers = #tpu.dot_dimension_numbers<[1], [0], [0], [1], [0, 0, 1, 1], [], []>} : vector<8x8xf32>, vector<8x8xf32>, vector<8x8xf32> -> vector<8x8xf32>
    %33 = vector.extract_strided_slice %5 {offsets = [0, 8], sizes = [8, 8], strides = [1, 1]} : vector<8x32xf32> to vector<8x8xf32>
    %34 = vector.extract_strided_slice %8 {offsets = [0, 8], sizes = [8, 8], strides = [1, 1]} : vector<8x32xf32> to vector<8x8xf32>
    %35 = vector.extract_strided_slice %9 {offsets = [0, 8], sizes = [8, 8], strides = [1, 1]} : vector<8x32xf32> to vector<8x8xf32>
    %cst_14 = arith.constant dense<0.000000e+00> : vector<8x8xf32>
    %36 = tpu.matmul %33, %34, %cst_14 {dimension_numbers = #tpu.dot_dimension_numbers<[1], [1], [0], [0], [0, 0, 1, 0], [], []>} : vector<8x8xf32>, vector<8x8xf32>, vector<8x8xf32> -> vector<8x8xf32>
    %cst_15 = arith.constant 0xFF800000 : f32
    %37 = vector.broadcast %cst_15 : f32 to vector<8x8xf32>
    %38 = arith.select %15, %36, %37 : vector<8x8xi1>, vector<8x8xf32>
    %cst_16 = arith.constant dense<0xFF800000> : vector<8xf32>
    %39 = vector.multi_reduction <maximumf>, %38, %cst_16 [1] : vector<8x8xf32> to vector<8xf32>
    %40 = vector.shape_cast %39 : vector<8xf32> to vector<8x1xf32>
    %41 = vector.broadcast %40 : vector<8x1xf32> to vector<8x8xf32>
    %42 = arith.subf %38, %41 : vector<8x8xf32>
    %43 = math.exp %42 : vector<8x8xf32>
    %cst_17 = arith.constant dense<0.000000e+00> : vector<8xf32>
    %44 = vector.multi_reduction <add>, %43, %cst_17 [1] : vector<8x8xf32> to vector<8xf32>
    %45 = vector.shape_cast %44 : vector<8xf32> to vector<8x1xf32>
    %46 = tpu.reciprocal %45 {approx = true} : vector<8x1xf32> -> vector<8x1xf32>
    %47 = vector.broadcast %46 : vector<8x1xf32> to vector<8x8xf32>
    %48 = arith.mulf %43, %47 : vector<8x8xf32>
    %cst_18 = arith.constant dense<0.000000e+00> : vector<8x8xf32>
    %49 = tpu.matmul %48, %35, %cst_18 {dimension_numbers = #tpu.dot_dimension_numbers<[1], [0], [0], [1], [0, 0, 1, 1], [], []>} : vector<8x8xf32>, vector<8x8xf32>, vector<8x8xf32> -> vector<8x8xf32>
    %50 = vector.extract_strided_slice %5 {offsets = [0, 16], sizes = [8, 8], strides = [1, 1]} : vector<8x32xf32> to vector<8x8xf32>
    %51 = vector.extract_strided_slice %8 {offsets = [0, 16], sizes = [8, 8], strides = [1, 1]} : vector<8x32xf32> to vector<8x8xf32>
    %52 = vector.extract_strided_slice %9 {offsets = [0, 16], sizes = [8, 8], strides = [1, 1]} : vector<8x32xf32> to vector<8x8xf32>
    %cst_19 = arith.constant dense<0.000000e+00> : vector<8x8xf32>
    %53 = tpu.matmul %50, %51, %cst_19 {dimension_numbers = #tpu.dot_dimension_numbers<[1], [1], [0], [0], [0, 0, 1, 0], [], []>} : vector<8x8xf32>, vector<8x8xf32>, vector<8x8xf32> -> vector<8x8xf32>
    %cst_20 = arith.constant 0xFF800000 : f32
    %54 = vector.broadcast %cst_20 : f32 to vector<8x8xf32>
    %55 = arith.select %15, %53, %54 : vector<8x8xi1>, vector<8x8xf32>
    %cst_21 = arith.constant dense<0xFF800000> : vector<8xf32>
    %56 = vector.multi_reduction <maximumf>, %55, %cst_21 [1] : vector<8x8xf32> to vector<8xf32>
    %57 = vector.shape_cast %56 : vector<8xf32> to vector<8x1xf32>
    %58 = vector.broadcast %57 : vector<8x1xf32> to vector<8x8xf32>
    %59 = arith.subf %55, %58 : vector<8x8xf32>
    %60 = math.exp %59 : vector<8x8xf32>
    %cst_22 = arith.constant dense<0.000000e+00> : vector<8xf32>
    %61 = vector.multi_reduction <add>, %60, %cst_22 [1] : vector<8x8xf32> to vector<8xf32>
    %62 = vector.shape_cast %61 : vector<8xf32> to vector<8x1xf32>
    %63 = tpu.reciprocal %62 {approx = true} : vector<8x1xf32> -> vector<8x1xf32>
    %64 = vector.broadcast %63 : vector<8x1xf32> to vector<8x8xf32>
    %65 = arith.mulf %60, %64 : vector<8x8xf32>
    %cst_23 = arith.constant dense<0.000000e+00> : vector<8x8xf32>
    %66 = tpu.matmul %65, %52, %cst_23 {dimension_numbers = #tpu.dot_dimension_numbers<[1], [0], [0], [1], [0, 0, 1, 1], [], []>} : vector<8x8xf32>, vector<8x8xf32>, vector<8x8xf32> -> vector<8x8xf32>
    %67 = vector.extract_strided_slice %5 {offsets = [0, 24], sizes = [8, 8], strides = [1, 1]} : vector<8x32xf32> to vector<8x8xf32>
    %68 = vector.extract_strided_slice %8 {offsets = [0, 24], sizes = [8, 8], strides = [1, 1]} : vector<8x32xf32> to vector<8x8xf32>
    %69 = vector.extract_strided_slice %9 {offsets = [0, 24], sizes = [8, 8], strides = [1, 1]} : vector<8x32xf32> to vector<8x8xf32>
    %cst_24 = arith.constant dense<0.000000e+00> : vector<8x8xf32>
    %70 = tpu.matmul %67, %68, %cst_24 {dimension_numbers = #tpu.dot_dimension_numbers<[1], [1], [0], [0], [0, 0, 1, 0], [], []>} : vector<8x8xf32>, vector<8x8xf32>, vector<8x8xf32> -> vector<8x8xf32>
    %cst_25 = arith.constant 0xFF800000 : f32
    %71 = vector.broadcast %cst_25 : f32 to vector<8x8xf32>
    %72 = arith.select %15, %70, %71 : vector<8x8xi1>, vector<8x8xf32>
    %cst_26 = arith.constant dense<0xFF800000> : vector<8xf32>
    %73 = vector.multi_reduction <maximumf>, %72, %cst_26 [1] : vector<8x8xf32> to vector<8xf32>
    %74 = vector.shape_cast %73 : vector<8xf32> to vector<8x1xf32>
    %75 = vector.broadcast %74 : vector<8x1xf32> to vector<8x8xf32>
    %76 = arith.subf %72, %75 : vector<8x8xf32>
    %77 = math.exp %76 : vector<8x8xf32>
    %cst_27 = arith.constant dense<0.000000e+00> : vector<8xf32>
    %78 = vector.multi_reduction <add>, %77, %cst_27 [1] : vector<8x8xf32> to vector<8xf32>
    %79 = vector.shape_cast %78 : vector<8xf32> to vector<8x1xf32>
    %80 = tpu.reciprocal %79 {approx = true} : vector<8x1xf32> -> vector<8x1xf32>
    %81 = vector.broadcast %80 : vector<8x1xf32> to vector<8x8xf32>
    %82 = arith.mulf %77, %81 : vector<8x8xf32>
    %cst_28 = arith.constant dense<0.000000e+00> : vector<8x8xf32>
    %83 = tpu.matmul %82, %69, %cst_28 {dimension_numbers = #tpu.dot_dimension_numbers<[1], [0], [0], [1], [0, 0, 1, 1], [], []>} : vector<8x8xf32>, vector<8x8xf32>, vector<8x8xf32> -> vector<8x8xf32>
    %84 = tpu.concatenate %32, %49, %66, %83 in 1 : vector<8x8xf32>, vector<8x8xf32>, vector<8x8xf32>, vector<8x8xf32> -> vector<8x32xf32>
    %c0_29 = arith.constant 0 : index
    %c0_30 = arith.constant 0 : index
    %85 = vector.load %arg5[%c0_29, %c0_30] : memref<32x32xf32, #tpu.memory_space<vmem>>, vector<32x32xf32>
    %cst_31 = arith.constant dense<0.000000e+00> : vector<8x32xf32>
    %86 = tpu.matmul %84, %85, %cst_31 {dimension_numbers = #tpu.dot_dimension_numbers<[1], [0], [0], [1], [0, 0, 1, 1], [], []>} : vector<8x32xf32>, vector<32x32xf32>, vector<8x32xf32> -> vector<8x32xf32>
    %c0_32 = arith.constant 0 : index
    %c0_33 = arith.constant 0 : index
    %87 = vector.load %arg6[%c0_32, %c0_33] : memref<1x32xf32, #tpu.memory_space<vmem>>, vector<1x32xf32>
    %88 = vector.broadcast %87 : vector<1x32xf32> to vector<8x32xf32>
    %89 = arith.addf %86, %88 : vector<8x32xf32>
    %c0_34 = arith.constant 0 : index
    %c0_35 = arith.constant 0 : index
    %c0_36 = arith.constant 0 : index
    %90 = vector.load %arg7[%c0_34, %c0_35, %c0_36] : memref<1x8x32xf32, #tpu.memory_space<vmem>>, vector<1x8x32xf32>
    %91 = vector.shape_cast %90 : vector<1x8x32xf32> to vector<8x32xf32>
    %92 = vector.shape_cast %89 : vector<8x32xf32> to vector<1x8x32xf32>
    tpu.vector_store %arg7[%c0_34, %c0_35, %c0_36], %92 {strides = array<i32>} : memref<1x8x32xf32, #tpu.memory_space<vmem>>, vector<1x8x32xf32>,
    return
  }
  func.func @transform_0(%arg0: i32, %arg1: i32) -> (i32, i32, i32) {
    %c0_i32 = arith.constant 0 : i32
    %c0_i32_0 = arith.constant 0 : i32
    return %arg0, %arg1, %c0_i32 : i32, i32, i32
  }
  func.func @transform_1(%arg0: i32, %arg1: i32) -> (i32, i32, i32) {
    %c0_i32 = arith.constant 0 : i32
    %c0_i32_0 = arith.constant 0 : i32
    %c0_i32_1 = arith.constant 0 : i32
    return %arg0, %c0_i32, %c0_i32_0 : i32, i32, i32
  }
  func.func @transform_2(%arg0: i32, %arg1: i32) -> (i32, i32) {
    %c0_i32 = arith.constant 0 : i32
    %c0_i32_0 = arith.constant 0 : i32
    %c0_i32_1 = arith.constant 0 : i32
    return %c0_i32, %c0_i32_0 : i32, i32
  }
  func.func @transform_3(%arg0: i32, %arg1: i32) -> (i32, i32) {
    %c0_i32 = arith.constant 0 : i32
    %c0_i32_0 = arith.constant 0 : i32
    %c0_i32_1 = arith.constant 0 : i32
    return %c0_i32, %c0_i32_0 : i32, i32
  }
  func.func @transform_4(%arg0: i32, %arg1: i32) -> (i32, i32) {
    %c0_i32 = arith.constant 0 : i32
    %c0_i32_0 = arith.constant 0 : i32
    %c0_i32_1 = arith.constant 0 : i32
    return %c0_i32, %c0_i32_0 : i32, i32
  }
  func.func @transform_5(%arg0: i32, %arg1: i32) -> (i32, i32, i32) {
    %c0_i32 = arith.constant 0 : i32
    %c0_i32_0 = arith.constant 0 : i32
    return %arg0, %arg1, %c0_i32 : i32, i32, i32
  }
}

</mosaic_0001>

<bundles_post_ra>
// kernel: tpu_custom_call.1
= control target key start
LH: loop header
LB: loop body
LE: loop exit
PB: predicated region body
PF: predicated region fallthrough
CT: control target
= control target key end

     0   :  { %s2325_s0 = inlined_call_operand.hbm [shape: f32[2,8,32], index: 0, kind: input, shape index: {}]   ;;  %s2326_s1 = inlined_call_operand.hbm [shape: f32[2,8,32], index: 1, kind: input, shape index: {}]   ;;  %s2327_s2 = inlined_call_operand.hbm [shape: f32[32,96], index: 2, kind: input, shape index: {}]   ;;  %s2328_s3 = inlined_call_operand.hbm [shape: f32[32,32], index: 3, kind: input, shape index: {}]   ;;  %s2329_s4 = inlined_call_operand.vmem [shape: f32[1,32], index: 4, kind: input, shape index: {}]   ;;  %s2330_s5 = inlined_call_operand.hbm [shape: f32[2,8,32], index: 5, kind: output, shape index: {}]  }
   0x1   :  { %2337 = sst [smem:[#allocation18_spill]] %s2327_s2 }
   0x2   :  { %2338 = sst [smem:[#allocation19_spill]] %s2328_s3 }
   0x3   :  { %10 = vsyncpa [#allocation3], 0 }
   0x4   :  { %12 = vsyncpa [#allocation3 + $0x1], 0 }
   0x5   :  { %13 = vsyncpa [#allocation6], 0 }
   0x6   :  { %15 = vsyncpa [#allocation6 + $0x1], 0 }
   0x7   :  { %16 = vsyncpa [#allocation9], 0 }
   0x8   :  { %17 = vsyncpa [#allocation4], 0 }
   0x9   :  { %19 = vsyncpa [#allocation4 + $0x1], 0  ;;  %s1951_s18 = smov 0   ;;  %s1953_s19 = smov 0  }
   0xa   :  { %s1955_s20 = smov 0   ;;  %s1957_s21 = smov 0  }
   0xb   :  { %s1959_s22 = smov 0   ;;  %s1961_s23 = smov 0  }
   0xc LB: > { %2339 = sst [smem:[#allocation16_spill]] %s1895_s22  ;;  %s1982_s24 = sadd.s32 4294967295, %s1899_s23   ;;  %s1899_s23 = sphi %s1961_s23, %s25_s23   ;;  %s1895_s22 = sphi %s1959_s22, %s2360_s22   ;;  %s1891_s21 = sphi %s1957_s21, %s2359_s21   ;;  %s1887_s20 = sphi %s1955_s20, %s2363_s20   ;;  %s1883_s19 = sphi %s1953_s19, %s2362_s19   ;;  %s1879_s18 = sphi %s1951_s18, %s2361_s18  }
   0xd   : > { %s1403_s25 = sadd.s32 4294967294, %s1899_s23   ;;  %p59_p0 = scmp.ne.s32.totalorder %s1883_s19, %s1879_s18 }
   0xe   : > { %p2331_p1 = scmp.eq.s32.totalorder %s1982_s24, 0  ;;  %p180_p3 = scmp.eq.s32.totalorder %s1403_s25, 1 }
   0xf   : > { %p1404_p5 = scmp.ge.s32.totalorder %s1899_s23, 1  ;;  %p187_p7 = scmp.lt.s32.totalorder %s1899_s23, 3 }
  0x10   : > { %p1991_p4 = por %p2331_p1, %p59_p0  ;;  %p1996_p6 = por %p180_p3, %p59_p0 }
  0x11   : > { %p2001_p8 = pnand %p1404_p5, %p187_p7  ;;  %s1901_s29 = smov [#allocation7]  }
  0x12   : > { %s2340_s26 = scalar_select %p1991_p4, 1, 0 }
  0x13   : > { %s2341_s27 = scalar_select %p1996_p6, 1, 0 }
  0x14   : > { %s2342_s28 = scalar_select %p2001_p8, 1, 0 }
  0x15   : > { %s199_s30 = sshll.u32 %s1901_s29, 4  ;;  %p1574_p9 = pneg %p2001_p8  ;;  %s2005_s30 = int_to_ptr.vmem [resolvable:$true] %s199_s30 }
  0x16   : > { %s1902_s7 = smov [#allocation8]   ;;  %s2344_s2 = sld [smem:[#allocation18_spill]] }
  0x17   : > { %p2012_p11 = pnand %p1574_p9, %p2331_p1  ;;  %s212_s8 = sshll.u32 %s1902_s7, 4  ;;  %s2016_s8 = int_to_ptr.vmem [resolvable:$true] %s212_s8 }
  0x19   : > { %p1691_p13 = pneg %p2012_p11 }
  0x1c   : > { %s1689_s11 = scalar_lea.hbm %s2344_s2, 512 }
  0x1d   : > { %p1690_p12 = scmp.ne.s32.totalorder %s2344_s2, %s1689_s11  ;;  %p1696_p5 = scmp.lt.u32.totalorder %s1689_s11, %s2344_s2 }
  0x1f   : > { %p1692_p0 = pnand %p1691_p13, %p1690_p12 }
  0x21   : > { %p1693_p3 = pneg %p1692_p0 }
  0x23   : > { %p1698_p7 = pnand %p1696_p5, %p1693_p3 }
  0x25   : > { %1701 = shalt.err (!%p1698_p7)
}
  0x26   : > { %s1702_s16 = scalar_lea.vmem %s2005_s30, 512  ;;  %p1710_p2 = scmp.lt.s32.totalorder %s2005_s30, %s2005_s30 }
  0x27   : > { %p1703_p9 = scmp.ne.s32.totalorder %s2005_s30, %s1702_s16  ;;  %p1711_p12 = scmp.lt.s32.totalorder %s1702_s16, %s1702_s16 }
  0x29   : > { %p1705_p10 = pnand %p1703_p9, %p1691_p13  ;;  %p1712_p0 = por %p1711_p12, %p1710_p2 }
  0x2b   : > { %p1706_p1 = pneg %p1705_p10 }
  0x2d   : > { %p1713_p6 = pnand %p1712_p0, %p1706_p1 }
  0x2f   : > { %1716 = shalt.err (!%p1713_p6)
}
  0x30   : > { %s1903_s17 = smov 128   ;;  %s1904_s25 = smov 8  }
  0x31   : > { %1577 = dma.hbm_to_vmem [thread:$0]  (!%p2012_p11), %s2344_s2, 512, %s2005_s30, [#allocation6], %s1903_s17, %s1903_s17, %s1904_s25  }
  0x32   : > { %s2345_s3 = sld [smem:[#allocation19_spill]] }
  0x38   : > { %s1717_s11 = scalar_lea.hbm %s2345_s3, 512 }
  0x39   : > { %p1718_p2 = scmp.ne.s32.totalorder %s2345_s3, %s1717_s11  ;;  %p1724_p10 = scmp.lt.u32.totalorder %s1717_s11, %s2345_s3 }
  0x3b   : > { %p1720_p1 = pnand %p1718_p2, %p1691_p13 }
  0x3d   : > { %p1721_p6 = pneg %p1720_p1 }
  0x3f   : > { %p1726_p3 = pnand %p1724_p10, %p1721_p6 }
  0x41   : > { %1729 = shalt.err (!%p1726_p3)
}
  0x42   : > { %s1730_s30 = scalar_lea.vmem %s2016_s8, 512  ;;  %p1738_p12 = scmp.lt.s32.totalorder %s2016_s8, %s2016_s8 }
  0x43   : > { %p1731_p5 = scmp.ne.s32.totalorder %s2016_s8, %s1730_s30  ;;  %p1739_p0 = scmp.lt.s32.totalorder %s1730_s30, %s1730_s30 }
  0x45   : > { %p1733_p7 = pnand %p1731_p5, %p1691_p13  ;;  %p1740_p2 = por %p1739_p0, %p1738_p12 }
  0x47   : > { %p1734_p9 = pneg %p1733_p7 }
  0x49   : > { %p1741_p1 = pnand %p1740_p2, %p1734_p9 }
  0x4b   : > { %1744 = shalt.err (!%p1741_p1)
}
  0x4c   : > { %1580 = dma.hbm_to_vmem [thread:$0]  (!%p2012_p11), %s2345_s3, 512, %s2016_s8, [#allocation9], %s1903_s17, %s1903_s17, %s1904_s25  }
  0x4d   : > { %s37_s7 = sadd.s32 1, %s1895_s22  ;;  %s46_s9 = sadd.s32 1, %s1887_s20 }
  0x4e   : > { %p39_p13 = scmp.ge.s32.totalorder %s37_s7, 2  ;;  %p53_p6 = scmp.ne.s32.totalorder %s1887_s20, %s1883_s19 }
  0x4f   : > { %p54_p10 = scmp.eq.s32.totalorder %s1899_s23, 0  ;;  %p1594_p3 = scmp.lt.s32.totalorder %s1899_s23, 2 }
  0x50   : > { %s2365_s7 = smov (%p39_p13, %s37_s7), 0  ;;  %p2347_p7 = scmp.eq.s32.totalorder %s1982_s24, 1 }
  0x51   : > { %2346 = sst [smem:[#allocation17_spill]] %s2365_s7  ;;  %p55_p5 = por %p54_p10, %p53_p6 }
  0x52   : > { %p2080_p9 = por %p2347_p7, %p53_p6  ;;  %s41_s10 = ssub.s32 %s1895_s22, %s2365_s7 }
  0x53   : > { %s229_s11 = sand.u32 1, %s1887_s20   ;;  %p44_p12 = scmp.eq.s32.totalorder %s41_s10, 0 }
  0x54   : > { %s2348_s6 = scalar_select %p2080_p9, 1, 0 }
  0x55   : > { %s2087_s8 = sshll.u32 %s229_s11, 3  ;;  %s1409_s17 = sshll.u32 %s1895_s22, 7 }
  0x56   : > { %s2091_s25 = scalar_select %p44_p12, %s1887_s20, %s46_s9  }
  0x57   : > { %s2096_s14 = scalar_lea.hbm %s2325_s0, %s1409_s17  ;;  %s233_s15 = scalar_lea.vmem [#allocation2], %s2087_s8 }
  0x58   : > { %s241_s30 = sshll.u32 %s233_s15, 4  ;;  %p2101_p11 = pnand %p1594_p3, %p55_p5  ;;  %s2105_s30 = int_to_ptr.vmem [resolvable:$true] %s241_s30 }
  0x59   : > { %s2110_s10 = scalar_lea.hbm %s2326_s1, %s1409_s17  ;;  %s230_s12 = scalar_lea.sflag [#allocation3], %s229_s11 }
  0x5a   : > { %s1745_s13 = scalar_lea.hbm %s2096_s14, 128  ;;  %p1747_p2 = pneg %p2101_p11 }
  0x5b   : > { %p1746_p0 = scmp.ne.s32.totalorder %s2096_s14, %s1745_s13  ;;  %s1750_s3 = scalar_lea.hbm %s2325_s0, 256 }
  0x5c   : > { %p1751_p6 = scmp.lt.u32.totalorder %s2096_s14, %s2325_s0  ;;  %p1752_p10 = scmp.lt.u32.totalorder %s1750_s3, %s1745_s13 }
  0x5d   : > { %p1748_p1 = pnand %p1747_p2, %p1746_p0  ;;  %p1754_p5 = scmp.lt.u32.totalorder %s1745_s13, %s2096_s14 }
  0x5e   : > { %p1753_p3 = por %p1752_p10, %p1751_p6 }
  0x5f   : > { %p1749_p13 = pneg %p1748_p1 }
  0x60   : > { %p1755_p7 = por %p1754_p5, %p1753_p3 }
  0x62   : > { %p1756_p12 = pnand %p1755_p7, %p1749_p13 }
  0x64   : > { %1759 = shalt.err (!%p1756_p12)
}
  0x65   : > { %s1760_s11 = scalar_lea.vmem %s2105_s30, 128  ;;  %s1905_s2 = smov [#allocation2]  }
  0x66   : > { %p1761_p0 = scmp.ne.s32.totalorder %s2105_s30, %s1760_s11  ;;  %s1765_s17 = sshll.u32 %s1905_s2, 4  ;;  %s1766_s17 = int_to_ptr.vmem [resolvable:$false] %s1765_s17 }
  0x67   : > { %s1767_s22 = scalar_lea.vmem %s1766_s17, 256  ;;  %p1768_p4 = scmp.lt.s32.totalorder %s2105_s30, %s1766_s17 }
  0x68   : > { %p1763_p1 = pnand %p1761_p0, %p1747_p2  ;;  %p1769_p6 = scmp.lt.s32.totalorder %s1767_s22, %s1760_s11 }
  0x6a   : > { %p1764_p9 = pneg %p1763_p1  ;;  %p1770_p10 = por %p1769_p6, %p1768_p4 }
  0x6c   : > { %p1771_p3 = pnand %p1770_p10, %p1764_p9 }
  0x6e   : > { %1774 = shalt.err (!%p1771_p3)
}
  0x6f   : > { %1584 = dma.hbm_to_vmem [thread:$0]  (!%p2101_p11), %s2096_s14, 128, %s2105_s30, %s230_s12  }
  0x70   : > { %s248_s3 = sand.u32 1, %s1899_s23   ;;  %s252_s7 = scalar_lea.vmem [#allocation5], %s2087_s8 }
  0x71   : > { %s259_s29 = sshll.u32 %s252_s7, 4  ;;  %s249_s9 = scalar_lea.sflag [#allocation6], %s248_s3  ;;  %s260_s29 = int_to_ptr.vmem [resolvable:$true] %s259_s29 }
  0x72   : > { %s1775_s13 = scalar_lea.hbm %s2110_s10, 128  ;;  %s1780_s2 = scalar_lea.hbm %s2326_s1, 256 }
  0x73   : > { %p1776_p4 = scmp.ne.s32.totalorder %s2110_s10, %s1775_s13  ;;  %p1781_p5 = scmp.lt.u32.totalorder %s2110_s10, %s2326_s1 }
  0x74   : > { %p1782_p7 = scmp.lt.u32.totalorder %s1780_s2, %s1775_s13  ;;  %p1784_p0 = scmp.lt.u32.totalorder %s1775_s13, %s2110_s10 }
  0x75   : > { %p1778_p9 = pnand %p1776_p4, %p1747_p2 }
  0x76   : > { %p1783_p12 = por %p1782_p7, %p1781_p5 }
  0x77   : > { %p1779_p13 = pneg %p1778_p9 }
  0x78   : > { %p1785_p1 = por %p1784_p0, %p1783_p12 }
  0x7a   : > { %p1786_p6 = pnand %p1785_p1, %p1779_p13 }
  0x7c   : > { %1789 = shalt.err (!%p1786_p6)
}
  0x7d   : > { %s1790_s8 = scalar_lea.vmem %s260_s29, 128  ;;  %s1906_s14 = smov [#allocation5]  }
  0x7e   : > { %p1791_p10 = scmp.ne.s32.totalorder %s260_s29, %s1790_s8  ;;  %s1795_s30 = sshll.u32 %s1906_s14, 4  ;;  %s1796_s30 = int_to_ptr.vmem [resolvable:$false] %s1795_s30 }
  0x7f   : > { %s1797_s12 = scalar_lea.vmem %s1796_s30, 256  ;;  %p1798_p9 = scmp.lt.s32.totalorder %s260_s29, %s1796_s30 }
  0x80   : > { %p1793_p3 = pnand %p1791_p10, %p1747_p2  ;;  %p1799_p8 = scmp.lt.s32.totalorder %s1797_s12, %s1790_s8 }
  0x82   : > { %p1794_p4 = pneg %p1793_p3  ;;  %p1800_p5 = por %p1799_p8, %p1798_p9 }
  0x84   : > { %p1801_p7 = pnand %p1800_p5, %p1794_p4 }
  0x86   : > { %1804 = shalt.err (!%p1801_p7)
}
  0x87   : > { %1587 = dma.hbm_to_vmem [thread:$0]  (!%p2101_p11), %s2110_s10, 128, %s260_s29, %s249_s9  }
  0x88   : > { %p2350_p13 = scmp.ne.s32.totalorder %s2342_s28, 0 }
  0x89   : > { %s2161_s3 = sand.u32 (!%p2350_p13), 1, %s1883_s19   ;;  %p2351_p8 = scmp.ne.s32.totalorder (!%p2350_p13), %s2340_s26, 0 }
  0x8a   : > { %268 = sbr.rel (%p2350_p13) target bundleno = 1709 (0x6ad), region = 40  ;;  %s2164_s7 = sshll.u32 (!%p2350_p13), %s2161_s3, 3 }
  0x8b   : > { %s271_s13 = scalar_lea.sflag (!%p2350_p13), [#allocation3], %s2161_s3  ;;  %s274_s15 = scalar_lea.vmem (!%p2350_p13), [#allocation2], %s2164_s7 }
  0x91   : > { %1858 = dma.done.wait (%p2351_p8), %s271_s13, 128  }
  0x92   : > { %1860 = vsyncadd (%p2351_p8), %s271_s13, 4294967168  ;;  %s279_s28 = sand.u32 1, %s1982_s24   ;;  %s283_s10 = scalar_lea.vmem [#allocation5], %s2164_s7 }
  0x93   : > { %s280_s16 = scalar_lea.sflag [#allocation6], %s279_s28 }
  0x94   : > { %1862 = dma.done.wait (%p2351_p8), %s280_s16, 128  }
  0x95   : > { %1864 = vsyncadd (%p2351_p8), %s280_s16, 4294967168  ;;  %p2352_p11 = scmp.eq.s32.totalorder %s1982_s24, 0 }
  0x97   : > { %1866 = dma.done.wait (%p2352_p11), [#allocation6], 512   ;;  %p2353_p2 = pmov %p2352_p11 }
  0x99   : > { %1868 = vsyncadd (%p2353_p2), [#allocation6], 4294966784  ;;  %p2354_p12 = pmov %p2353_p2 }
  0x9a   : > { %p2355_p0 = pmov %p2353_p2 }
  0x9b   : > { %1870 = dma.done.wait (%p2354_p12), [#allocation9], 512  }
  0x9c   : > { %1872 = vsyncadd (%p2355_p0), [#allocation9], 4294966784  ;;  %v1907_v0 = vmov 0.0|0.0   ;;  %vm1908_vm0 = vmmov 0   ;;  %v1909_v1 = vmov 0.0   ;;  %v325_v2 = vld [vmem:[#allocation7] sm:$0xff]  ;;  %v493_v30 = vlaneseq }
  0x9d   : > { %1548 = vmatprep.subr.bf16.mxu1 %v1907_v0  ;;  %1542 = vmatprep.subr.bf16.mxu0 %v1907_v0  ;;  %v326_v3 = vld [vmem:[#allocation7 + $0x8] sm:$0xff]  ;;  %v327_v4 = vld [vmem:[#allocation7 + $0x10] sm:$0xff]  ;;  %v328_v6 = vld [vmem:[#allocation7 + $0x18] sm:$0xff]  ;;  %s1910_s24 = smov 96   ;;  %vm329_vm1 = vcmask 261120   ;;  %vm500_vm2 = vcmask 64512  }
  0x9e   : > { %1488 = vmatprep.mubr.msk.f32.mxu1 %vm1908_vm0, %v1909_v1  ;;  %1477 = vmatprep.mubr.msk.f32.mxu0 %vm1908_vm0, %v1909_v1  ;;  %v1663_v5 = vpack.i.bf16 %v326_v3, %v325_v2  ;;  %v1543_v7 = vpack.c.bf16 %v326_v3, %v325_v2  ;;  %v1668_v8 = vpack.i.bf16 %v328_v6, %v327_v4  ;;  %v323_v10 = vld [vmem:[%s274_s15] sm:$0xff]  ;;  %v324_v19 = vld [vmem:[%s283_s10] sm:$0xff]  ;;  %s1911_s26 = smov 112   ;;  %s1912_s29 = smov 120   ;;  %v494_v31 = vshrl.u32 %v493_v30, 7 }
  0x9f   : > { %v1546_v9 = vpack.c.bf16 %v328_v6, %v327_v4  ;;  %s1913_s9 = smov 104   ;;  %v498_v32 = vand.u32 127, %v493_v30  ;;  %s1914_s11 = smov 80   ;;  %vm1176_vm4 = vcmask 130048   ;;  %vm1178_vm5 = vcmask 195584  }
  0xa0   : > { %1664 = vrot.lane.b32.xlu0 %v1663_v5, %s1910_s24  ;;  %1544 = vmatpush3.bf16.msra.mxu0 %v1543_v7  ;;  %s1915_s2 = smov 72   ;;  %s1916_s17 = smov 88  }
  0xa1   : > { %1545 = vmatprep.subr.bf16.mxu0 %v1907_v0  ;;  %vm499_vm3 = vcmp.le.s32.totalorder %v498_v32, %v494_v31  ;;  %s1917_s22 = smov 8   ;;  %s1918_s8 = smov 16  }
  0xa2   : > { %s1919_s14 = smov 24   ;;  %s1435_s13 = sshll.u32 %s1891_s21, 7 }
  0xa3   : > { %s322_s15 = scalar_lea.vmem [#allocation10], %s2164_s7  ;;  %p2356_p6 = scmp.ne.s32.totalorder %s2348_s6, 0 }
  0xa4   : > { %1669 = vrot.lane.b32.xlu0 %v1668_v8, %s1910_s24  ;;  %1547 = vmatpush3.bf16.msra.mxu0 %v1546_v9  ;;  %s1280_s28 = sshll.u32 %s322_s15, 4  ;;  %s1920_s21 = smov [#allocation10]   ;;  %s2277_s28 = int_to_ptr.vmem [resolvable:$true] %s1280_s28 }
  0xa5   : > { %1501 = vmatprep.subr.mxu0 %v1909_v1  ;;  %s1809_s7 = sshll.u32 %s1920_s21, 4  ;;  %s1810_s7 = int_to_ptr.vmem [resolvable:$false] %s1809_s7 }
  0xa6   : > { %p1812_p4 = scmp.lt.s32.totalorder %s2277_s28, %s1810_s7 }
  0xa7   : > { %1478 = vmatmul.mubr.msk.f32.vlgmr.msra.gmra.mrb[0].mxu0 %vm329_vm1, %v323_v10 }
  0xa8   : > { %1503 = vmatprep.mubr.msk.f32.mxu0 %vm1908_vm0, %v1909_v1 }
 0x112   : > { %v1665_v11 = vpop.permute.xlu0 %1664 }
 0x113   : > { %v1667_v12 = vunpack.i.h.bf16 %v1665_v11  ;;  %v1666_v13 = vunpack.i.l.bf16 %v1665_v11 }
 0x115   : > { %v1549_v14 = vpack.c.bf16 %v1667_v12, %v1666_v13 }
 0x116   : > { %v1670_v15 = vpop.permute.xlu0 %1669 }
 0x117   : > { %v1672_v16 = vunpack.i.h.bf16 %v1670_v15  ;;  %v1671_v17 = vunpack.i.l.bf16 %v1670_v15  ;;  %1550 = vmatpush3.bf16.msra.mxu1 %v1549_v14 }
 0x118   : > { %1551 = vmatprep.subr.bf16.mxu1 %v1907_v0 }
 0x119   : > { %v1552_v18 = vpack.c.bf16 %v1672_v16, %v1671_v17 }
 0x11b   : > { %1553 = vmatpush3.bf16.msra.mxu1 %v1552_v18 }
 0x11c   : > { %1491 = vmatprep.subr.mxu1 %v1909_v1 }
 0x11e   : > { %1489 = vmatmul.mubr.msk.f32.vlgmr.msra.gmra.mrb[0].mxu1 %vm329_vm1, %v324_v19 }
 0x11f   : > { %1493 = vmatprep.mubr.msk.f32.mxu1 %vm1908_vm0, %v1909_v1 }
 0x17a   : > { %v399_v20 = vpop.f32.mrb[0].mxu0 }
 0x17b   : > { %v1479_v21 = vpop.f32.mrb[1].mxu0 }
 0x1f1   : > { %v2208_v22 = vpop.f32.mrb[0].mxu1 }
 0x1f2   : > { %833 = vrot.lane.b32.xlu0 %v2208_v22, %s1911_s26  ;;  %667 = vrot.lane.b32.xlu1 %v2208_v22, %s1912_s29  ;;  %v1490_v23 = vpop.f32.mrb[1].mxu1 }
 0x1f3   : > { %1492 = vmatpush3.xpose.msk.msra.mxu1 %vm500_vm2, %v2208_v22 }
 0x1f4   : > { %1496 = vmatprep.subr.mxu1 %v1909_v1 }
 0x1f6   : > { %1494 = vmatmul.mubr.msk.f32.vlgmr.msra.gmra.mrb[2].mxu1 %vm500_vm2, %v399_v20  ;;  %999 = vrot.lane.b32.xlu0 %v2208_v22, %s1913_s9 }
 0x1f7   : > { %665 = vrot.lane.b32.xlu1 %v399_v20, %s1912_s29  ;;  %1498 = vmatprep.mubr.msk.f32.mxu1 %vm1908_vm0, %v1909_v1  ;;  %s1805_s29 = scalar_lea.vmem %s2277_s28, 128 }
 0x1f8   : > { %p1806_p1 = scmp.ne.s32.totalorder %s2277_s28, %s1805_s29 }
 0x1fa   : > { %p1807_p10 = pnand %p1806_p1, %p2356_p6 }
 0x1fb   : > { %831 = vrot.lane.b32.xlu1 %v399_v20, %s1911_s26  ;;  %s1266_s26 = scalar_lea.sflag [#allocation4], %s2161_s3 }
 0x1fc   : > { %p1808_p3 = pneg %p1807_p10 }
 0x1ff   : > { %997 = vrot.lane.b32.xlu1 %v399_v20, %s1913_s9  ;;  %s1811_s9 = scalar_lea.vmem %s1810_s7, 256 }
 0x200   : > { %p1813_p9 = scmp.lt.s32.totalorder %s1811_s9, %s1805_s29 }
 0x202   : > { %p1814_p5 = por %p1813_p9, %p1812_p4 }
 0x204   : > { %p1815_p7 = pnand %p1814_p5, %p1808_p3 }
 0x264   : > { %v668_v24 = vpop.permute.xlu1 %667  ;;  %v834_v25 = vpop.permute.xlu0 %833 }
 0x265   : > { %1502 = vmatpush3.xpose.msk.msra.mxu0 %vm500_vm2, %v668_v24 }
 0x266   : > { %1511 = vmatprep.subr.mxu0 %v1909_v1 }
 0x268   : > { %v1000_v28 = vpop.permute.xlu0 %999 }
 0x269   : > { %v666_v26 = vpop.permute.xlu1 %665 }
 0x26a   : > { %1504 = vmatmul.mubr.msk.f32.vlgmr.msra.gmra.mrb[2].mxu0 %vm500_vm2, %v666_v26  ;;  %v1181_v26 = vld [vmem:[#allocation8 + $0x8] sm:$0xff] }
 0x26b   : > { %1512 = vmatpush3.xpose.msk.msra.mxu0 %vm500_vm2, %v834_v25  ;;  %1513 = vmatprep.mubr.msk.f32.mxu0 %vm1908_vm0, %v1909_v1  ;;  %v1180_v25 = vld [vmem:[#allocation8] sm:$0xff] }
 0x26c   : > { %1521 = vmatprep.subr.mxu0 %v1909_v1 }
 0x26d   : > { %v832_v27 = vpop.permute.xlu1 %831 }
 0x26e   : > { %1514 = vmatmul.mubr.msk.f32.vlgmr.msra.gmra.mrb[4].mxu0 %vm500_vm2, %v832_v27  ;;  %v1555_v27 = vpack.c.bf16 %v1181_v26, %v1180_v25 }
 0x26f   : > { %1522 = vmatpush3.xpose.msk.msra.mxu0 %vm500_vm2, %v1000_v28  ;;  %1523 = vmatprep.mubr.msk.f32.mxu0 %vm1908_vm0, %v1909_v1  ;;  %v1182_v28 = vld [vmem:[#allocation8 + $0x10] sm:$0xff] }
 0x270   : > { %1554 = vmatprep.subr.bf16.mxu0 %v1907_v0 }
 0x271   : > { %v998_v29 = vpop.permute.xlu1 %997 }
 0x272   : > { %1524 = vmatmul.mubr.msk.f32.vlgmr.msra.gmra.mrb[6].mxu0 %vm500_vm2, %v998_v29  ;;  %v1183_v29 = vld [vmem:[#allocation8 + $0x18] sm:$0xff] }
 0x273   : > { %1539 = vmatprep.mubr.msk.f32.mxu0 %vm1908_vm0, %v1909_v1  ;;  %1556 = vmatpush3.bf16.msra.mxu0 %v1555_v27  ;;  %v1558_v30 = vpack.c.bf16 %v1183_v29, %v1182_v28 }
 0x274   : > { %1557 = vmatprep.subr.bf16.mxu0 %v1907_v0 }
 0x277   : > { %1559 = vmatpush3.bf16.msra.mxu0 %v1558_v30 }
 0x2c9   : > { %v573_v33 = vpop.f32.mrb[2].mxu1 }
 0x2ca   : > { %v577_v34 = vsel %vm499_vm3, %v573_v33, -inf  ;;  %v1495_v35 = vpop.f32.mrb[3].mxu1 }
 0x2cb   : > { %v578_v36 = vsel %vm500_vm2, %v577_v34, -inf }
 0x2cc   : > { %579 = vmax.xlane.f32.xlu0 %v578_v36 }
 0x33d   : > { %v739_v37 = vpop.f32.mrb[2].mxu0 }
 0x33e   : > { %v743_v38 = vsel %vm499_vm3, %v739_v37, -inf  ;;  %v1505_v39 = vpop.f32.mrb[3].mxu0 }
 0x33f   : > { %v744_v40 = vsel %vm500_vm2, %v743_v38, -inf }
 0x340   : > { %745 = vmax.xlane.f32.xlu1 %v744_v40 }
 0x341   : > { %v905_v41 = vpop.f32.mrb[4].mxu0 }
 0x342   : > { %v909_v42 = vsel %vm499_vm3, %v905_v41, -inf  ;;  %v1515_v43 = vpop.f32.mrb[5].mxu0  ;;  %v1432_v41 = vld [vmem:[%s2329_s4] ss:$0 sm:$0xff] }
 0x343   : > { %v910_v44 = vsel %vm500_vm2, %v909_v42, -inf }
 0x344   : > { %911 = vmax.xlane.f32.xlu0 %v910_v44 }
 0x345   : > { %v1071_v45 = vpop.f32.mrb[6].mxu0 }
 0x346   : > { %v1075_v46 = vsel %vm499_vm3, %v1071_v45, -inf  ;;  %v1525_v47 = vpop.f32.mrb[7].mxu0 }
 0x347   : > { %v1076_v48 = vsel %vm500_vm2, %v1075_v46, -inf }
 0x348   : > { %1077 = vmax.xlane.f32.xlu0 %v1076_v48 }
 0x351   : > { %589 = vrot.lane.b32.xlu1 %v2208_v22, %s1910_s24  ;;  %s2275_s24 = scalar_lea.hbm %s2330_s5, %s1435_s13 }
 0x359   : > { %v580_v49 = vpop.xlane.xlu0 %579 }
 0x35a   : > { %v581_v50 = vsub.f32 %v577_v34, %v580_v49 }
 0x35c   : > { %v582_v51 = vmul.f32 1.442695, %v581_v50 }
 0x35e   : > { %1673 = vpow2.f32 %v582_v51 }
 0x368   : > { %v1674_v52 = vpop.eup %1673 }
 0x369   : > { %v584_v53 = vsel %vm500_vm2, %v1674_v52, 0.0 }
 0x375   : > { %585 = vadd.xlane.f32.xlu1 %v584_v53 }
 0x3cd   : > { %v746_v54 = vpop.xlane.xlu1 %745 }
 0x3ce   : > { %v747_v55 = vsub.f32 %v743_v38, %v746_v54 }
 0x3d0   : > { %v748_v56 = vmul.f32 1.442695, %v747_v55 }
 0x3d1   : > { %v590_v57 = vpop.permute.xlu1 %589  ;;  %v912_v58 = vpop.xlane.xlu0 %911 }
 0x3d2   : > { %1675 = vpow2.f32 %v748_v56  ;;  %v913_v59 = vsub.f32 %v909_v42, %v912_v58  ;;  %1497 = vmatpush3.msra.mxu1 %v590_v57 }
 0x3d3   : > { %1506 = vmatprep.subr.mxu1 %v1909_v1 }
 0x3d4   : > { %v914_v60 = vmul.f32 1.442695, %v913_v59 }
 0x3d5   : > { %v1078_v61 = vpop.xlane.xlu0 %1077 }
 0x3d6   : > { %1677 = vpow2.f32 %v914_v60  ;;  %v1079_v62 = vsub.f32 %v1075_v46, %v1078_v61 }
 0x3d8   : > { %v1080_v63 = vmul.f32 1.442695, %v1079_v62 }
 0x3da   : > { %1679 = vpow2.f32 %v1080_v63 }
 0x3dc   : > { %v1676_v2 = vpop.eup %1675 }
 0x3dd   : > { %v750_v3 = vsel %vm500_vm2, %v1676_v2, 0.0 }
 0x3de   : > { %751 = vadd.xlane.f32.xlu0 %v750_v3 }
 0x3e0   : > { %v1678_v4 = vpop.eup %1677 }
 0x3e1   : > { %v916_v5 = vsel %vm500_vm2, %v1678_v4, 0.0 }
 0x3e2   : > { %917 = vadd.xlane.f32.xlu1 %v916_v5 }
 0x3e4   : > { %v1680_v6 = vpop.eup %1679 }
 0x3e5   : > { %v1082_v7 = vsel %vm500_vm2, %v1680_v6, 0.0 }
 0x3e6   : > { %1083 = vadd.xlane.f32.xlu0 %v1082_v7 }
 0x3f3   : > { %921 = vrot.lane.b32.xlu1 %v2208_v22, %s1914_s11 }
 0x3f7   : > { %1087 = vrot.lane.b32.xlu1 %v2208_v22, %s1915_s2 }
 0x3fc   : > { %755 = vrot.lane.b32.xlu0 %v2208_v22, %s1916_s17 }
 0x402   : > { %v586_v8 = vpop.xlane.xlu1 %585 }
 0x403   : > { %1681 = vrcp.f32 %v586_v8 }
 0x40d   : > { %v1682_v9 = vpop.eup %1681 }
 0x40e   : > { %v588_v10 = vmul.f32 %v1682_v9, %v1674_v52 }
 0x410   : > { %1499 = vmatmul.mubr.msk.f32.vlgmr.msra.gmra.mrb[4].mxu1 %vm500_vm2, %v588_v10 }
 0x411   : > { %1508 = vmatprep.mubr.msk.f32.mxu1 %vm1908_vm0, %v1909_v1 }
 0x46b   : > { %v752_v11 = vpop.xlane.xlu0 %751 }
 0x46c   : > { %1683 = vrcp.f32 %v752_v11 }
 0x46f   : > { %v918_v12 = vpop.xlane.xlu1 %917 }
 0x470   : > { %1685 = vrcp.f32 %v918_v12 }
 0x473   : > { %v1084_v13 = vpop.xlane.xlu0 %1083  ;;  %v922_v16 = vpop.permute.xlu1 %921 }
 0x474   : > { %1687 = vrcp.f32 %v1084_v13 }
 0x476   : > { %v1684_v14 = vpop.eup %1683 }
 0x477   : > { %v754_v15 = vmul.f32 %v1684_v14, %v1676_v2  ;;  %v756_v17 = vpop.permute.xlu0 %755  ;;  %v1088_v20 = vpop.permute.xlu1 %1087 }
 0x478   : > { %1507 = vmatpush3.msra.mxu1 %v756_v17 }
 0x479   : > { %1509 = vmatmul.mubr.msk.f32.vlgmr.msra.gmra.mrb[6].mxu1 %vm500_vm2, %v754_v15  ;;  %1516 = vmatprep.subr.mxu1 %v1909_v1 }
 0x47a   : > { %v1686_v18 = vpop.eup %1685  ;;  %1517 = vmatpush3.msra.mxu1 %v922_v16  ;;  %1518 = vmatprep.mubr.msk.f32.mxu1 %vm1908_vm0, %v1909_v1 }
 0x47b   : > { %v920_v19 = vmul.f32 %v1686_v18, %v1678_v4  ;;  %1526 = vmatprep.subr.mxu1 %v1909_v1 }
 0x47d   : > { %1519 = vmatmul.mubr.msk.f32.vlgmr.msra.gmra.mrb[8].mxu1 %vm500_vm2, %v920_v19 }
 0x47e   : > { %v1688_v21 = vpop.eup %1687  ;;  %1527 = vmatpush3.msra.mxu1 %v1088_v20  ;;  %1528 = vmatprep.mubr.msk.f32.mxu1 %vm1908_vm0, %v1909_v1 }
 0x47f   : > { %v1086_v22 = vmul.f32 %v1688_v21, %v1680_v6 }
 0x481   : > { %1529 = vmatmul.mubr.msk.f32.vlgmr.msra.gmra.mrb[10].mxu1 %vm500_vm2, %v1086_v22 }
 0x4e3   : > { %v661_v23 = vpop.f32.mrb[4].mxu1 }
 0x4e4   : > { %v1500_v24 = vpop.f32.mrb[5].mxu1 }
 0x54c   : > { %v827_v31 = vpop.f32.mrb[6].mxu1 }
 0x54d   : > { %1164 = vrot.lane.b32.xlu0 %v827_v31, %s1917_s22  ;;  %v1510_v32 = vpop.f32.mrb[7].mxu1 }
 0x550   : > { %v993_v1 = vpop.f32.mrb[8].mxu1 }
 0x551   : > { %1168 = vrot.lane.b32.xlu1 %v993_v1, %s1918_s8  ;;  %v1520_v33 = vpop.f32.mrb[9].mxu1 }
 0x554   : > { %v1159_v34 = vpop.f32.mrb[10].mxu1 }
 0x555   : > { %1172 = vrot.lane.b32.xlu0 %v1159_v34, %s1919_s14  ;;  %v1530_v35 = vpop.f32.mrb[11].mxu1 }
 0x5bf   : > { %v1165_v36 = vpop.permute.xlu0 %1164 }
 0x5c0   : > { %v1175_v37 = vsel %vm500_vm2, %v661_v23, %v1165_v36 }
 0x5c3   : > { %v1169_v0 = vpop.permute.xlu1 %1168 }
 0x5c4   : > { %v1177_v38 = vsel %vm1176_vm4, %v1175_v37, %v1169_v0 }
 0x5c7   : > { %v1173_v39 = vpop.permute.xlu0 %1172 }
 0x5c8   : > { %v1179_v40 = vsel %vm1178_vm5, %v1177_v38, %v1173_v39 }
 0x5c9   : > { %1540 = vmatmul.mubr.msk.f32.vlgmr.msra.gmra.mrb[8].mxu0 %vm329_vm1, %v1179_v40 }
 0x69c   : > { %v1260_v42 = vpop.f32.mrb[8].mxu0 }
 0x69d   : > { %v1261_v43 = vadd.f32 %v1432_v41, %v1260_v42  ;;  %v1541_v44 = vpop.f32.mrb[9].mxu0 }
 0x69f   : > { %1264 = vst.msk [vmem:[%s322_s15] sm:$0xff] %vm329_vm1, %v1261_v43 }
 0x6a0   : > { %1818 = shalt.err (!%p1815_p7)
}
 0x6a1   : > { %s1819_s3 = scalar_lea.hbm %s2275_s24, 128  ;;  %s1823_s17 = scalar_lea.hbm %s2330_s5, 256 }
 0x6a2   : > { %p1820_p13 = scmp.ne.s32.totalorder %s2275_s24, %s1819_s3  ;;  %p1824_p2 = scmp.lt.u32.totalorder %s2275_s24, %s2330_s5 }
 0x6a3   : > { %p1825_p12 = scmp.lt.u32.totalorder %s1823_s17, %s1819_s3  ;;  %p1827_p1 = scmp.lt.u32.totalorder %s1819_s3, %s2275_s24 }
 0x6a4   : > { %p1821_p8 = pnand %p1820_p13, %p2356_p6 }
 0x6a5   : > { %p1826_p0 = por %p1825_p12, %p1824_p2 }
 0x6a6   : > { %p1822_p11 = pneg %p1821_p8 }
 0x6a7   : > { %p1828_p10 = por %p1827_p1, %p1826_p0 }
 0x6a9   : > { %p1829_p3 = pnand %p1828_p10, %p1822_p11 }
 0x6ab   : > { %1832 = shalt.err (!%p1829_p3)
}
 0x6ac   : > { %1572 = dma.vmem_to_hbm [thread:$0]  (%p2356_p6), %s2277_s28, 128, %s2275_s24, %s1266_s26  }
 0x6ad PF: > { %s1292_s14 = sand.u32 1, %s1879_s18   ;;  %p2357_p4 = scmp.ne.s32.totalorder %s2341_s27, 0 }
 0x6ae   : > { %p2358_p9 = scmp.ge.s32.totalorder %s1899_s23, 2  ;;  %s1293_s30 = scalar_lea.sflag [#allocation4], %s1292_s14 }
 0x6b0   : > { %p1589_p5 = pnand %p2358_p9, %p2357_p4 }
 0x6b2   : > { %1874 = dma.done.wait (!%p1589_p5), %s1293_s30, 128  }
 0x6b3   : > { %1876 = vsyncadd (!%p1589_p5), %s1293_s30, 4294967168  ;;  %s25_s23 = sadd.s32 1, %s1899_s23   ;;  %s2359_s21 = sld [smem:[#allocation16_spill]] }
 0x6b4   : > { %p22_p7 = scmp.ge.s32.totalorder %s25_s23, 4   ;;  %s2360_s22 = sld [smem:[#allocation17_spill]] }
 0x6b5   : > { %s2361_s18 = smov %s1883_s19  ;;  %s2362_s19 = smov %s1887_s20 }
 0x6b6   : > { %s2363_s20 = smov %s2091_s25  ;;  %24 = sbr.rel (!%p22_p7) target bundleno = 12 (0xc), region = 106 }
 0x6bd   :  { %1298 = vsyncpa [#allocation3], 1 }
 0x6be   :  { %1300 = vsyncpa [#allocation3 + $0x1], 1 }
 0x6bf   :  { %1301 = vsyncpa [#allocation6], 1 }
 0x6c0   :  { %1303 = vsyncpa [#allocation6 + $0x1], 1 }
 0x6c1   :  { %1304 = vsyncpa [#allocation9], 1 }
 0x6c2   :  { %1305 = vsyncpa [#allocation4], 1 }
 0x6c3   :  { %1307 = vsyncpa [#allocation4 + $0x1], 1 }

</bundles_post_ra>
